<compile_context>
chip_gen: v7x
topology: tpu7x:2x2x1
jax: 0.10.0
libtpu: 0.0.40
codegen_flags: <defaults>
</compile_context>

<pallas_src>
import jax
import jax.numpy as jnp
from jax.experimental import pallas as pl
from jax.experimental.pallas import tpu as pltpu

EPS = 0.0  # GINEConv default eps


def _round_up(v, m):
    return ((v + m - 1) // m) * m


def _vmem_limit_bytes():
    """Chip-aware scoped-VMEM limit: leave >=16 MiB headroom (v7x has 64 MiB)."""
    try:
        cap = int(pltpu.get_tpu_info().vmem_capacity_bytes)
    except Exception:
        cap = 64 * 1024 * 1024  # conservative (v7x-sized) fallback
    return max(32 * 1024 * 1024, min(cap - 16 * 1024 * 1024, 100 * 1024 * 1024))


def gnn_encoder_kernel(
    src_ref,                                   # scalar prefetch: [E_pad] int32 (SMEM)
    x_hbm, ea_ref, dst_ref, batch_ref,
    wle_ref, ble_ref, w1_ref, b1_ref, w2_ref, b2_ref,
    out_ref,
    h_ref, agg_ref, xj_ref, sem,
):
    l = pl.program_id(0)          # layer index: 0, 1
    e = pl.program_id(1)          # edge-tile index (reduction axis)
    n_l = pl.num_programs(0)
    n_e = pl.num_programs(1)

    te = ea_ref.shape[0]          # edges per tile
    n_nodes = h_ref.shape[0]      # padded node count

    # Seed the persistent node-feature scratch once (x lives in HBM, copied once).
    @pl.when(jnp.logical_and(l == 0, e == 0))
    def _seed():
        cp = pltpu.make_async_copy(x_hbm, h_ref, sem)
        cp.start()
        cp.wait()

    # Reset the scatter accumulator at the start of each layer's edge sweep.
    @pl.when(e == 0)
    def _reset():
        agg_ref[...] = jnp.zeros_like(agg_ref)

    # ---- per-edge-tile message + scatter-add (all f32 accumulation) ----
    # Edge-feature linear (edge_dim -> D).
    e_feat = jnp.dot(ea_ref[...], wle_ref[...],
                     preferred_element_type=jnp.float32) + ble_ref[...]        # [TE, D]

    # Row gather h[src] via dynamic-slice copies driven by SMEM indices
    # (no [TE, N] one-hot, no O(TE*N*D) MXU work).  Padded src are 0 (host-
    # clamped); the extra in-kernel clamp guards against any OOB VMEM read.
    base = e * te

    @pl.loop(0, te)
    def _gather(i):
        sid = jnp.minimum(src_ref[base + i], n_nodes - 1)
        xj_ref[pl.ds(i, 1), :] = h_ref[pl.ds(sid, 1), :]

    msg = jnp.maximum(xj_ref[...] + e_feat, 0.0)                               # ReLU(x_j + e)

    # Scatter-sum at destination nodes with a pre-transposed one-hot [N, TE]:
    # contraction dim (TE) sits on lanes -> plain MXU matmul, no transpose.
    # Padded edges carry dst == n_nodes (sentinel) -> all-zero column -> dropped.
    node_iota = jax.lax.broadcasted_iota(jnp.int32, (n_nodes, te), 0)
    smask_t = (dst_ref[...] == node_iota).astype(jnp.float32)                  # [N, TE]
    agg_ref[...] += jnp.dot(smask_t, msg, preferred_element_type=jnp.float32)  # [N, D]

    # ---- layer finalize: GIN MLP + trailing ReLU, update node features ----
    @pl.when(e == n_e - 1)
    def _finalize():
        h = agg_ref[...] + (1.0 + EPS) * h_ref[...]
        h = jnp.maximum(
            jnp.dot(h, w1_ref[...], preferred_element_type=jnp.float32) + b1_ref[...], 0.0)
        h = jnp.maximum(
            jnp.dot(h, w2_ref[...], preferred_element_type=jnp.float32) + b2_ref[...], 0.0)
        # NOTE: padded node rows accumulate ReLU(bias) values here; this is safe
        # because real src indices are always < n_nodes (never gather a padded
        # row) and the pool membership mask excludes padded rows (batch sentinel).
        h_ref[...] = h

    # ---- after the last layer: global mean pool over `batch` (f32 normalize) ----
    @pl.when(jnp.logical_and(l == n_l - 1, e == n_e - 1))
    def _pool():
        n_graphs = out_ref.shape[0]
        g_iota = jax.lax.broadcasted_iota(jnp.int32, (n_graphs, n_nodes), 0)
        memb = (batch_ref[...] == g_iota).astype(jnp.float32)      # [B, N] membership
        sums = jnp.dot(memb, h_ref[...], preferred_element_type=jnp.float32)
        cnts = jnp.sum(memb, axis=1, keepdims=True)
        out_ref[...] = sums / jnp.maximum(cnts, 1.0)


def gnn_encoder_forward(x, edge_index, edge_attr, batch, params, num_graphs,
                        *, edge_tile=512):
    """Pad to lane-dense shapes, stack per-layer weights, run one pallas_call."""
    n_nodes, input_dim = x.shape
    n_edges, edge_dim = edge_attr.shape
    hidden_dim = params["w11"].shape[1]
    output_dim = params["w22"].shape[1]

    # Common lane-dense feature width; node/edge counts padded for tiling.
    dp = _round_up(max(input_dim, hidden_dim, output_dim, edge_dim), 128)
    n_pad = _round_up(n_nodes, 8)
    te = max(8, _round_up(min(edge_tile, n_edges), 8))
    e_pad = _round_up(n_edges, te)
    n_tiles = e_pad // te

    def pad2(a, rows, cols):
        return jnp.pad(a, ((0, rows - a.shape[0]), (0, cols - a.shape[1])))

    x_p = pad2(x.astype(jnp.float32), n_pad, dp)
    ea_p = pad2(edge_attr.astype(jnp.float32), e_pad, dp)

    # src: flat int32 [E_pad] for SMEM scalar prefetch; padded entries clamped to 0
    # (their messages are discarded by the all-zero dst one-hot column).
    src_flat = jnp.zeros((e_pad,), jnp.int32).at[:n_edges].set(
        edge_index[0].astype(jnp.int32))
    # dst: lane-dense (n_tiles, 1, TE) tiles; padded entries carry sentinel >= n_pad.
    dst_flat = jnp.full((e_pad,), jnp.int32(n_pad), jnp.int32).at[:n_edges].set(
        edge_index[1].astype(jnp.int32))
    dst_p = dst_flat.reshape(n_tiles, 1, te)
    batch_p = jnp.full((1, n_pad), jnp.int32(num_graphs), jnp.int32)
    batch_p = batch_p.at[0, :n_nodes].set(batch.astype(jnp.int32))

    # Stack per-layer weights; the layer grid axis picks the block (squeezed dim).
    wle = jnp.stack([pad2(params["wle1"], dp, dp), pad2(params["wle2"], dp, dp)])
    ble = jnp.stack([pad2(params["ble1"], 1, dp), pad2(params["ble2"], 1, dp)])
    w1 = jnp.stack([pad2(params["w11"], dp, dp), pad2(params["w21"], dp, dp)])
    b1 = jnp.stack([pad2(params["b11"], 1, dp), pad2(params["b21"], 1, dp)])
    w2 = jnp.stack([pad2(params["w12"], dp, dp), pad2(params["w22"], dp, dp)])
    b2 = jnp.stack([pad2(params["b12"], 1, dp), pad2(params["b22"], 1, dp)])

    grid = (2, n_tiles)
    in_specs = [
        pl.BlockSpec(memory_space=pl.ANY),                            # x: stays in HBM
        pl.BlockSpec((te, dp), lambda l, e, src: (e, 0)),             # edge_attr tile
        pl.BlockSpec((None, 1, te), lambda l, e, src: (e, 0, 0)),     # dst tile (1, TE)
        pl.BlockSpec((1, n_pad), lambda l, e, src: (0, 0)),           # batch (graph ids)
        pl.BlockSpec((None, dp, dp), lambda l, e, src: (l, 0, 0)),    # edge-linear W
        pl.BlockSpec((None, 1, dp), lambda l, e, src: (l, 0, 0)),     # edge-linear b
        pl.BlockSpec((None, dp, dp), lambda l, e, src: (l, 0, 0)),    # MLP lin1 W
        pl.BlockSpec((None, 1, dp), lambda l, e, src: (l, 0, 0)),     # MLP lin1 b
        pl.BlockSpec((None, dp, dp), lambda l, e, src: (l, 0, 0)),    # MLP lin2 W
        pl.BlockSpec((None, 1, dp), lambda l, e, src: (l, 0, 0)),     # MLP lin2 b
    ]
    out_specs = pl.BlockSpec((num_graphs, dp), lambda l, e, src: (0, 0))
    scratch_shapes = [
        pltpu.VMEM((n_pad, dp), jnp.float32),   # current node features (x, then x1)
        pltpu.VMEM((n_pad, dp), jnp.float32),   # scatter-sum accumulator
        pltpu.VMEM((te, dp), jnp.float32),      # gathered x[src] rows for this tile
        pltpu.SemaphoreType.DMA,                # seed-copy semaphore
    ]

    grid_spec = pltpu.PrefetchScalarGridSpec(
        num_scalar_prefetch=1,
        grid=grid,
        in_specs=in_specs,
        out_specs=out_specs,
        scratch_shapes=scratch_shapes,
    )

    # Advisory cost estimate for XLA scheduling around the custom call.
    flops_layer = (2 * e_pad * dp * dp            # edge linear
                   + 2 * e_pad * n_pad * dp       # scatter contraction
                   + 2 * 2 * n_pad * dp * dp)     # GIN MLP (2 linears)
    flops = 2 * flops_layer + 2 * num_graphs * n_pad * dp
    bytes_accessed = 4 * (x_p.size + 2 * (ea_p.size + dst_p.size) + src_flat.size
                          + batch_p.size + wle.size + ble.size + w1.size
                          + b1.size + w2.size + b2.size + num_graphs * dp)

    out_p = pl.pallas_call(
        gnn_encoder_kernel,
        out_shape=jax.ShapeDtypeStruct((num_graphs, dp), jnp.float32),
        grid_spec=grid_spec,
        compiler_params=pltpu.CompilerParams(
            # layer axis is sequential, edge axis is a reduction -> both arbitrary
            dimension_semantics=("arbitrary", "arbitrary"),
            vmem_limit_bytes=_vmem_limit_bytes(),
        ),
        cost_estimate=pl.CostEstimate(flops=flops, transcendentals=0,
                                      bytes_accessed=bytes_accessed),
    )(src_flat, x_p, ea_p, dst_p, batch_p, wle, ble, w1, b1, w2, b2)

    return out_p[:, :output_dim]


def _linear_params(key, in_dim, out_dim):
    """Deterministic nn.Linear-style init; stored as [in, out] (x @ W + b)."""
    kw, kb = jax.random.split(key)
    bound = 1.0 / jnp.sqrt(in_dim)
    w = jax.random.uniform(kw, (in_dim, out_dim), jnp.float32, -bound, bound)
    b = jax.random.uniform(kb, (1, out_dim), jnp.float32, -bound, bound)
    return w, b


def init_params(key, input_dim, hidden_dim, output_dim, edge_dim):
    ks = jax.random.split(key, 6)
    p = {}
    p["wle1"], p["ble1"] = _linear_params(ks[0], edge_dim, input_dim)    # GINEConv1 edge lin
    p["w11"], p["b11"] = _linear_params(ks[1], input_dim, hidden_dim)    # conv1 MLP lin1
    p["w12"], p["b12"] = _linear_params(ks[2], hidden_dim, hidden_dim)   # conv1 MLP lin2
    p["wle2"], p["ble2"] = _linear_params(ks[3], edge_dim, hidden_dim)   # GINEConv2 edge lin
    p["w21"], p["b21"] = _linear_params(ks[4], hidden_dim, hidden_dim)   # conv2 MLP lin1
    p["w22"], p["b22"] = _linear_params(ks[5], hidden_dim, output_dim)   # conv2 MLP lin2
    return p


def reference_forward(x, edge_index, edge_attr, batch, params, num_graphs):
    """Pure-JAX reference (same math, scatter via segment_sum) for validation."""
    src, dst = edge_index[0], edge_index[1]

    def layer(x, w_e, b_e, w1, b1, w2, b2):
        e = edge_attr @ w_e + b_e
        msg = jnp.maximum(x[src] + e, 0.0)
        agg = jax.ops.segment_sum(msg, dst, num_segments=x.shape[0])
        h = agg + (1.0 + EPS) * x
        h = jnp.maximum(h @ w1 + b1, 0.0)
        return jnp.maximum(h @ w2 + b2, 0.0)

    x1 = layer(x, params["wle1"], params["ble1"], params["w11"],
               params["b11"], params["w12"], params["b12"])
    x2 = layer(x1, params["wle2"], params["ble2"], params["w21"],
               params["b21"], params["w22"], params["b22"])
    sums = jax.ops.segment_sum(x2, batch, num_segments=num_graphs)
    cnts = jax.ops.segment_sum(jnp.ones((x.shape[0], 1), jnp.float32), batch,
                               num_segments=num_graphs)
    return sums / jnp.maximum(cnts, 1.0)


if __name__ == "__main__":
    INPUT_DIM, HIDDEN_DIM, OUTPUT_DIM, EDGE_DIM = 8, 32, 16, 4
    N_NODES, N_EDGES, N_GRAPHS = 16, 32, 2

    key = jax.random.PRNGKey(0)
    k_param, k_x, k_ea, k_src, k_dst = jax.random.split(key, 5)

    params = init_params(k_param, INPUT_DIM, HIDDEN_DIM, OUTPUT_DIM, EDGE_DIM)

    x = jax.random.normal(k_x, (N_NODES, INPUT_DIM), jnp.float32)
    edge_attr = jax.random.normal(k_ea, (N_EDGES, EDGE_DIM), jnp.float32)
    src = jax.random.randint(k_src, (N_EDGES,), 0, N_NODES)
    dst = jax.random.randint(k_dst, (N_EDGES,), 0, N_NODES)
    edge_index = jnp.stack([src, dst], axis=0)                  # [2, E], PyG convention
    batch = jnp.concatenate([jnp.zeros(N_NODES // 2, jnp.int32),
                             jnp.ones(N_NODES - N_NODES // 2, jnp.int32)])

    # edge_tile=16 -> 2 edge tiles, exercising the tiled accumulator path.
    out = gnn_encoder_forward(x, edge_index, edge_attr, batch, params, N_GRAPHS,
                              edge_tile=16)
    out = jax.block_until_ready(out)

    ref = reference_forward(x, edge_index, edge_attr, batch, params, N_GRAPHS)
    assert out.shape == (N_GRAPHS, OUTPUT_DIM)
    assert jnp.allclose(out, ref, rtol=1e-4, atol=1e-4), "mismatch vs JAX reference"

    print("KERNEL_OK")
</pallas_src>

<mosaic_0001>
module attributes {stable_mosaic.version = 11 : i64} {
  func.func @gnn_encoder_kernel(%arg0: i32, %arg1: i32, %arg2: memref<32xi32, #tpu.memory_space<smem>>, %arg3: memref<16x128xf32, #tpu.memory_space<any>>, %arg4: memref<16x128xf32, #tpu.memory_space<vmem>>, %arg5: memref<1x1x16xi32, #tpu.memory_space<vmem>>, %arg6: memref<1x16xi32, #tpu.memory_space<vmem>>, %arg7: memref<1x128x128xf32, #tpu.memory_space<vmem>>, %arg8: memref<1x1x128xf32, #tpu.memory_space<vmem>>, %arg9: memref<1x128x128xf32, #tpu.memory_space<vmem>>, %arg10: memref<1x1x128xf32, #tpu.memory_space<vmem>>, %arg11: memref<1x128x128xf32, #tpu.memory_space<vmem>>, %arg12: memref<1x1x128xf32, #tpu.memory_space<vmem>>, %arg13: memref<2x128xf32, #tpu.memory_space<vmem>>, %arg14: memref<16x128xf32, #tpu.memory_space<vmem>>, %arg15: memref<16x128xf32, #tpu.memory_space<vmem>>, %arg16: memref<16x128xf32, #tpu.memory_space<vmem>>, %arg17: memref<!tpu.dma_semaphore, #tpu.memory_space<semaphore_mem>>) attributes {dimension_semantics = [#tpu.dimension_semantics<arbitrary>, #tpu.dimension_semantics<arbitrary>], iteration_bounds = array<i64: 2, 2>, scalar_prefetch = 1 : i64, scratch_operands = 4 : i64, tpu.core_type = #tpu.core_type<tc>, window_params = [{}, {transform_indices = @transform_1, window_bounds = array<i64: 16, 128>}, {transform_indices = @transform_2, window_bounds = array<i64: 1, 1, 16>}, {pipeline_mode = #tpu.pipeline_mode<synchronous>, transform_indices = @transform_3, window_bounds = array<i64: 1, 16>}, {transform_indices = @transform_4, window_bounds = array<i64: 1, 128, 128>}, {transform_indices = @transform_5, window_bounds = array<i64: 1, 1, 128>}, {transform_indices = @transform_6, window_bounds = array<i64: 1, 128, 128>}, {transform_indices = @transform_7, window_bounds = array<i64: 1, 1, 128>}, {transform_indices = @transform_8, window_bounds = array<i64: 1, 128, 128>}, {transform_indices = @transform_9, window_bounds = array<i64: 1, 1, 128>}, {pipeline_mode = #tpu.pipeline_mode<synchronous>, transform_indices = @transform_10, window_bounds = array<i64: 2, 128>}]} {
    %c0_i32 = arith.constant 0 : i32
    %0 = arith.cmpi eq, %arg0, %c0_i32 : i32
    %c0_i32_0 = arith.constant 0 : i32
    %1 = arith.cmpi eq, %arg1, %c0_i32_0 : i32
    %2 = arith.andi %0, %1 : i1
    %3 = arith.extui %2 : i1 to i32
    %c0_i32_1 = arith.constant 0 : i32
    %4 = arith.cmpi ne, %3, %c0_i32_1 : i32
    scf.if %4 {
      tpu.enqueue_dma source(%arg3 : memref<16x128xf32, #tpu.memory_space<any>>) target(%arg14 : memref<16x128xf32, #tpu.memory_space<vmem>>) target_semaphore(%arg17 : memref<!tpu.dma_semaphore, #tpu.memory_space<semaphore_mem>>)
      tpu.wait_dma2 semaphore(%arg17 : memref<!tpu.dma_semaphore, #tpu.memory_space<semaphore_mem>>) src(%arg3 : memref<16x128xf32, #tpu.memory_space<any>>) dst(%arg14 : memref<16x128xf32, #tpu.memory_space<vmem>>)
    } else {
    }
    %c0_i32_2 = arith.constant 0 : i32
    %5 = arith.cmpi eq, %arg1, %c0_i32_2 : i32
    %6 = arith.extui %5 : i1 to i32
    %c0_i32_3 = arith.constant 0 : i32
    %7 = arith.cmpi ne, %6, %c0_i32_3 : i32
    scf.if %7 {
      %cst_30 = arith.constant 0.000000e+00 : f32
      %41 = vector.broadcast %cst_30 : f32 to vector<16x128xf32>
      %c0_31 = arith.constant 0 : index
      %c0_32 = arith.constant 0 : index
      %42 = vector.load %arg15[%c0_31, %c0_32] : memref<16x128xf32, #tpu.memory_space<vmem>>, vector<16x128xf32>
      tpu.vector_store %arg15[%c0_31, %c0_32], %41 {strides = array<i32>} : memref<16x128xf32, #tpu.memory_space<vmem>>, vector<16x128xf32>,
    } else {
    }
    %c0 = arith.constant 0 : index
    %c0_4 = arith.constant 0 : index
    %8 = vector.load %arg4[%c0, %c0_4] : memref<16x128xf32, #tpu.memory_space<vmem>>, vector<16x128xf32>
    %c0_5 = arith.constant 0 : index
    %c0_6 = arith.constant 0 : index
    %c0_7 = arith.constant 0 : index
    %9 = vector.load %arg7[%c0_5, %c0_6, %c0_7] : memref<1x128x128xf32, #tpu.memory_space<vmem>>, vector<1x128x128xf32>
    %10 = vector.shape_cast %9 : vector<1x128x128xf32> to vector<128x128xf32>
    %cst = arith.constant dense<0.000000e+00> : vector<16x128xf32>
    %11 = tpu.matmul %8, %10, %cst {dimension_numbers = #tpu.dot_dimension_numbers<[1], [0], [0], [1], [0, 0, 1, 1], [], []>} : vector<16x128xf32>, vector<128x128xf32>, vector<16x128xf32> -> vector<16x128xf32>
    %c0_8 = arith.constant 0 : index
    %c0_9 = arith.constant 0 : index
    %c0_10 = arith.constant 0 : index
    %12 = vector.load %arg8[%c0_8, %c0_9, %c0_10] : memref<1x1x128xf32, #tpu.memory_space<vmem>>, vector<1x1x128xf32>
    %13 = vector.shape_cast %12 : vector<1x1x128xf32> to vector<1x128xf32>
    %14 = vector.broadcast %13 : vector<1x128xf32> to vector<16x128xf32>
    %15 = arith.addf %11, %14 : vector<16x128xf32>
    %c16_i32 = arith.constant 16 : i32
    %16 = arith.muli %arg1, %c16_i32 : i32
    %c0_i32_11 = arith.constant 0 : i32
    %c16_i32_12 = arith.constant 16 : i32
    %17 = arith.addi %c0_i32_11, %c16_i32_12 : i32
    %c1_i32 = arith.constant 1 : i32
    scf.for %arg18 = %c0_i32_11 to %17 step %c1_i32  : i32 {
      %c1_i32_30 = arith.constant 1 : i32
      %41 = arith.muli %arg18, %c1_i32_30 : i32
      %c0_i32_31 = arith.constant 0 : i32
      %42 = arith.addi %c0_i32_31, %41 : i32
      %43 = arith.addi %16, %42 : i32
      %44 = arith.index_cast %43 : i32 to index
      %45 = memref.load %arg2[%44] : memref<32xi32, #tpu.memory_space<smem>>
      %c15_i32 = arith.constant 15 : i32
      %46 = arith.minsi %45, %c15_i32 : i32
      %47 = arith.index_cast %46 : i32 to index
      %c0_32 = arith.constant 0 : index
      %48 = vector.load %arg14[%47, %c0_32] : memref<16x128xf32, #tpu.memory_space<vmem>>, vector<1x128xf32>
      %49 = arith.index_cast %42 : i32 to index
      %c0_33 = arith.constant 0 : index
      %50 = vector.load %arg16[%49, %c0_33] : memref<16x128xf32, #tpu.memory_space<vmem>>, vector<1x128xf32>
      tpu.vector_store %arg16[%49, %c0_33], %48 {strides = array<i32>} : memref<16x128xf32, #tpu.memory_space<vmem>>, vector<1x128xf32>,
    }
    %c16_i32_13 = arith.constant 16 : i32
    %c0_14 = arith.constant 0 : index
    %c0_15 = arith.constant 0 : index
    %18 = vector.load %arg16[%c0_14, %c0_15] : memref<16x128xf32, #tpu.memory_space<vmem>>, vector<16x128xf32>
    %19 = arith.addf %18, %15 : vector<16x128xf32>
    %cst_16 = arith.constant 0.000000e+00 : f32
    %20 = vector.broadcast %cst_16 : f32 to vector<16x128xf32>
    %21 = arith.maximumf %19, %20 : vector<16x128xf32>
    %22 = tpu.iota {dimensions = array<i32: 0>} : vector<16x16xi32>
    %c0_17 = arith.constant 0 : index
    %c0_18 = arith.constant 0 : index
    %c0_19 = arith.constant 0 : index
    %23 = vector.load %arg5[%c0_17, %c0_18, %c0_19] : memref<1x1x16xi32, #tpu.memory_space<vmem>>, vector<1x1x16xi32>
    %24 = vector.shape_cast %23 : vector<1x1x16xi32> to vector<1x16xi32>
    %25 = vector.broadcast %24 : vector<1x16xi32> to vector<16x16xi32>
    %26 = arith.cmpi eq, %25, %22 : vector<16x16xi32>
    %27 = arith.extui %26 : vector<16x16xi1> to vector<16x16xi32>
    %28 = arith.sitofp %27 : vector<16x16xi32> to vector<16x16xf32>
    %c0_20 = arith.constant 0 : index
    %c0_21 = arith.constant 0 : index
    %29 = vector.load %arg15[%c0_20, %c0_21] : memref<16x128xf32, #tpu.memory_space<vmem>>, vector<16x128xf32>
    %cst_22 = arith.constant dense<0.000000e+00> : vector<16x128xf32>
    %30 = tpu.matmul %28, %21, %cst_22 {dimension_numbers = #tpu.dot_dimension_numbers<[1], [0], [0], [1], [0, 0, 1, 1], [], []>} : vector<16x16xf32>, vector<16x128xf32>, vector<16x128xf32> -> vector<16x128xf32>
    %31 = arith.addf %29, %30 : vector<16x128xf32>
    %c0_23 = arith.constant 0 : index
    %c0_24 = arith.constant 0 : index
    %32 = vector.load %arg15[%c0_23, %c0_24] : memref<16x128xf32, #tpu.memory_space<vmem>>, vector<16x128xf32>
    tpu.vector_store %arg15[%c0_23, %c0_24], %31 {strides = array<i32>} : memref<16x128xf32, #tpu.memory_space<vmem>>, vector<16x128xf32>,
    %c1_i32_25 = arith.constant 1 : i32
    %33 = arith.cmpi eq, %arg1, %c1_i32_25 : i32
    %34 = arith.extui %33 : i1 to i32
    %c0_i32_26 = arith.constant 0 : i32
    %35 = arith.cmpi ne, %34, %c0_i32_26 : i32
    scf.if %35 {
      %c0_30 = arith.constant 0 : index
      %c0_31 = arith.constant 0 : index
      %41 = vector.load %arg15[%c0_30, %c0_31] : memref<16x128xf32, #tpu.memory_space<vmem>>, vector<16x128xf32>
      %c0_32 = arith.constant 0 : index
      %c0_33 = arith.constant 0 : index
      %42 = vector.load %arg14[%c0_32, %c0_33] : memref<16x128xf32, #tpu.memory_space<vmem>>, vector<16x128xf32>
      %cst_34 = arith.constant 1.000000e+00 : f32
      %43 = vector.broadcast %cst_34 : f32 to vector<16x128xf32>
      %44 = arith.mulf %43, %42 : vector<16x128xf32>
      %45 = arith.addf %41, %44 : vector<16x128xf32>
      %c0_35 = arith.constant 0 : index
      %c0_36 = arith.constant 0 : index
      %c0_37 = arith.constant 0 : index
      %46 = vector.load %arg9[%c0_35, %c0_36, %c0_37] : memref<1x128x128xf32, #tpu.memory_space<vmem>>, vector<1x128x128xf32>
      %47 = vector.shape_cast %46 : vector<1x128x128xf32> to vector<128x128xf32>
      %cst_38 = arith.constant dense<0.000000e+00> : vector<16x128xf32>
      %48 = tpu.matmul %45, %47, %cst_38 {dimension_numbers = #tpu.dot_dimension_numbers<[1], [0], [0], [1], [0, 0, 1, 1], [], []>} : vector<16x128xf32>, vector<128x128xf32>, vector<16x128xf32> -> vector<16x128xf32>
      %c0_39 = arith.constant 0 : index
      %c0_40 = arith.constant 0 : index
      %c0_41 = arith.constant 0 : index
      %49 = vector.load %arg10[%c0_39, %c0_40, %c0_41] : memref<1x1x128xf32, #tpu.memory_space<vmem>>, vector<1x1x128xf32>
      %50 = vector.shape_cast %49 : vector<1x1x128xf32> to vector<1x128xf32>
      %51 = vector.broadcast %50 : vector<1x128xf32> to vector<16x128xf32>
      %52 = arith.addf %48, %51 : vector<16x128xf32>
      %cst_42 = arith.constant 0.000000e+00 : f32
      %53 = vector.broadcast %cst_42 : f32 to vector<16x128xf32>
      %54 = arith.maximumf %52, %53 : vector<16x128xf32>
      %c0_43 = arith.constant 0 : index
      %c0_44 = arith.constant 0 : index
      %c0_45 = arith.constant 0 : index
      %55 = vector.load %arg11[%c0_43, %c0_44, %c0_45] : memref<1x128x128xf32, #tpu.memory_space<vmem>>, vector<1x128x128xf32>
      %56 = vector.shape_cast %55 : vector<1x128x128xf32> to vector<128x128xf32>
      %cst_46 = arith.constant dense<0.000000e+00> : vector<16x128xf32>
      %57 = tpu.matmul %54, %56, %cst_46 {dimension_numbers = #tpu.dot_dimension_numbers<[1], [0], [0], [1], [0, 0, 1, 1], [], []>} : vector<16x128xf32>, vector<128x128xf32>, vector<16x128xf32> -> vector<16x128xf32>
      %c0_47 = arith.constant 0 : index
      %c0_48 = arith.constant 0 : index
      %c0_49 = arith.constant 0 : index
      %58 = vector.load %arg12[%c0_47, %c0_48, %c0_49] : memref<1x1x128xf32, #tpu.memory_space<vmem>>, vector<1x1x128xf32>
      %59 = vector.shape_cast %58 : vector<1x1x128xf32> to vector<1x128xf32>
      %60 = vector.broadcast %59 : vector<1x128xf32> to vector<16x128xf32>
      %61 = arith.addf %57, %60 : vector<16x128xf32>
      %cst_50 = arith.constant 0.000000e+00 : f32
      %62 = vector.broadcast %cst_50 : f32 to vector<16x128xf32>
      %63 = arith.maximumf %61, %62 : vector<16x128xf32>
      %c0_51 = arith.constant 0 : index
      %c0_52 = arith.constant 0 : index
      %64 = vector.load %arg14[%c0_51, %c0_52] : memref<16x128xf32, #tpu.memory_space<vmem>>, vector<16x128xf32>
      tpu.vector_store %arg14[%c0_51, %c0_52], %63 {strides = array<i32>} : memref<16x128xf32, #tpu.memory_space<vmem>>, vector<16x128xf32>,
    } else {
    }
    %c1_i32_27 = arith.constant 1 : i32
    %36 = arith.cmpi eq, %arg0, %c1_i32_27 : i32
    %c1_i32_28 = arith.constant 1 : i32
    %37 = arith.cmpi eq, %arg1, %c1_i32_28 : i32
    %38 = arith.andi %36, %37 : i1
    %39 = arith.extui %38 : i1 to i32
    %c0_i32_29 = arith.constant 0 : i32
    %40 = arith.cmpi ne, %39, %c0_i32_29 : i32
    scf.if %40 {
      %41 = tpu.iota {dimensions = array<i32: 0>} : vector<2x16xi32>
      %c0_30 = arith.constant 0 : index
      %c0_31 = arith.constant 0 : index
      %42 = vector.load %arg6[%c0_30, %c0_31] : memref<1x16xi32, #tpu.memory_space<vmem>>, vector<1x16xi32>
      %43 = vector.broadcast %42 : vector<1x16xi32> to vector<2x16xi32>
      %44 = arith.cmpi eq, %43, %41 : vector<2x16xi32>
      %45 = arith.extui %44 : vector<2x16xi1> to vector<2x16xi32>
      %46 = arith.sitofp %45 : vector<2x16xi32> to vector<2x16xf32>
      %c0_32 = arith.constant 0 : index
      %c0_33 = arith.constant 0 : index
      %47 = vector.load %arg14[%c0_32, %c0_33] : memref<16x128xf32, #tpu.memory_space<vmem>>, vector<16x128xf32>
      %cst_34 = arith.constant dense<0.000000e+00> : vector<2x128xf32>
      %48 = tpu.matmul %46, %47, %cst_34 {dimension_numbers = #tpu.dot_dimension_numbers<[1], [0], [0], [1], [0, 0, 1, 1], [], []>} : vector<2x16xf32>, vector<16x128xf32>, vector<2x128xf32> -> vector<2x128xf32>
      %cst_35 = arith.constant dense<0.000000e+00> : vector<2xf32>
      %49 = vector.multi_reduction <add>, %46, %cst_35 [1] : vector<2x16xf32> to vector<2xf32>
      %50 = vector.shape_cast %49 : vector<2xf32> to vector<2x1xf32>
      %cst_36 = arith.constant 1.000000e+00 : f32
      %51 = vector.broadcast %cst_36 : f32 to vector<2x1xf32>
      %52 = arith.maximumf %50, %51 : vector<2x1xf32>
      %53 = vector.broadcast %52 : vector<2x1xf32> to vector<2x128xf32>
      %54 = arith.divf %48, %53 : vector<2x128xf32>
      %c0_37 = arith.constant 0 : index
      %c0_38 = arith.constant 0 : index
      %55 = vector.load %arg13[%c0_37, %c0_38] : memref<2x128xf32, #tpu.memory_space<vmem>>, vector<2x128xf32>
      tpu.vector_store %arg13[%c0_37, %c0_38], %54 {strides = array<i32>} : memref<2x128xf32, #tpu.memory_space<vmem>>, vector<2x128xf32>,
    } else {
    }
    return
  }
  func.func @transform_1(%arg0: i32, %arg1: i32, %arg2: memref<32xi32, #tpu.memory_space<smem>>) -> (i32, i32) {
    %c0_i32 = arith.constant 0 : i32
    %c0_i32_0 = arith.constant 0 : i32
    return %arg1, %c0_i32 : i32, i32
  }
  func.func @transform_2(%arg0: i32, %arg1: i32, %arg2: memref<32xi32, #tpu.memory_space<smem>>) -> (i32, i32, i32) {
    %c0_i32 = arith.constant 0 : i32
    %c0_i32_0 = arith.constant 0 : i32
    %c0_i32_1 = arith.constant 0 : i32
    return %arg1, %c0_i32, %c0_i32_0 : i32, i32, i32
  }
  func.func @transform_3(%arg0: i32, %arg1: i32, %arg2: memref<32xi32, #tpu.memory_space<smem>>) -> (i32, i32) {
    %c0_i32 = arith.constant 0 : i32
    %c0_i32_0 = arith.constant 0 : i32
    %c0_i32_1 = arith.constant 0 : i32
    return %c0_i32, %c0_i32_0 : i32, i32
  }
  func.func @transform_4(%arg0: i32, %arg1: i32, %arg2: memref<32xi32, #tpu.memory_space<smem>>) -> (i32, i32, i32) {
    %c0_i32 = arith.constant 0 : i32
    %c0_i32_0 = arith.constant 0 : i32
    %c0_i32_1 = arith.constant 0 : i32
    return %arg0, %c0_i32, %c0_i32_0 : i32, i32, i32
  }
  func.func @transform_5(%arg0: i32, %arg1: i32, %arg2: memref<32xi32, #tpu.memory_space<smem>>) -> (i32, i32, i32) {
    %c0_i32 = arith.constant 0 : i32
    %c0_i32_0 = arith.constant 0 : i32
    %c0_i32_1 = arith.constant 0 : i32
    return %arg0, %c0_i32, %c0_i32_0 : i32, i32, i32
  }
  func.func @transform_6(%arg0: i32, %arg1: i32, %arg2: memref<32xi32, #tpu.memory_space<smem>>) -> (i32, i32, i32) {
    %c0_i32 = arith.constant 0 : i32
    %c0_i32_0 = arith.constant 0 : i32
    %c0_i32_1 = arith.constant 0 : i32
    return %arg0, %c0_i32, %c0_i32_0 : i32, i32, i32
  }
  func.func @transform_7(%arg0: i32, %arg1: i32, %arg2: memref<32xi32, #tpu.memory_space<smem>>) -> (i32, i32, i32) {
    %c0_i32 = arith.constant 0 : i32
    %c0_i32_0 = arith.constant 0 : i32
    %c0_i32_1 = arith.constant 0 : i32
    return %arg0, %c0_i32, %c0_i32_0 : i32, i32, i32
  }
  func.func @transform_8(%arg0: i32, %arg1: i32, %arg2: memref<32xi32, #tpu.memory_space<smem>>) -> (i32, i32, i32) {
    %c0_i32 = arith.constant 0 : i32
    %c0_i32_0 = arith.constant 0 : i32
    %c0_i32_1 = arith.constant 0 : i32
    return %arg0, %c0_i32, %c0_i32_0 : i32, i32, i32
  }
  func.func @transform_9(%arg0: i32, %arg1: i32, %arg2: memref<32xi32, #tpu.memory_space<smem>>) -> (i32, i32, i32) {
    %c0_i32 = arith.constant 0 : i32
    %c0_i32_0 = arith.constant 0 : i32
    %c0_i32_1 = arith.constant 0 : i32
    return %arg0, %c0_i32, %c0_i32_0 : i32, i32, i32
  }
  func.func @transform_10(%arg0: i32, %arg1: i32, %arg2: memref<32xi32, #tpu.memory_space<smem>>) -> (i32, i32) {
    %c0_i32 = arith.constant 0 : i32
    %c0_i32_0 = arith.constant 0 : i32
    %c0_i32_1 = arith.constant 0 : i32
    return %c0_i32, %c0_i32_0 : i32, i32
  }
}

</mosaic_0001>

<bundles_post_ra>
// kernel: tpu_custom_call.1
= control target key start
LH: loop header
LB: loop body
LE: loop exit
PB: predicated region body
PF: predicated region fallthrough
CT: control target
= control target key end

     0   :  { %s2647_s0 = inlined_call_operand.hbm [shape: s32[32], index: 0, kind: input, shape index: {}]   ;;  %s2648_s1 = inlined_call_operand.hbm [shape: f32[16,128], index: 1, kind: input, shape index: {}]   ;;  %s2649_s2 = inlined_call_operand.hbm [shape: f32[32,128], index: 2, kind: input, shape index: {}]   ;;  %s2650_s3 = inlined_call_operand.vmem [shape: s32[2,1,16], index: 3, kind: input, shape index: {}]   ;;  %s2651_s4 = inlined_call_operand.vmem [shape: s32[1,16], index: 4, kind: input, shape index: {}]   ;;  %s2652_s5 = inlined_call_operand.hbm [shape: f32[2,128,128], index: 5, kind: input, shape index: {}]   ;;  %s2653_s6 = inlined_call_operand.vmem [shape: f32[2,1,128], index: 6, kind: input, shape index: {}]   ;;  %s2654_s7 = inlined_call_operand.hbm [shape: f32[2,128,128], index: 7, kind: input, shape index: {}]   ;;  %s2655_s8 = inlined_call_operand.vmem [shape: f32[2,1,128], index: 8, kind: input, shape index: {}]   ;;  %s2656_s9 = inlined_call_operand.hbm [shape: f32[2,128,128], index: 9, kind: input, shape index: {}]   ;;  %s2657_s10 = inlined_call_operand.vmem [shape: f32[2,1,128], index: 10, kind: input, shape index: {}]   ;;  %s2658_s11 = inlined_call_operand.hbm [shape: f32[2,128], index: 11, kind: output, shape index: {}]  }
   0x1   :  { %2683 = sst [smem:[#allocation38_spill]] %s2648_s1  ;;  %s1736_s19 = scalar_lea.hbm %s2647_s0, 16 }
   0x2   :  { %2684 = sst [smem:[#allocation39_spill]] %s2649_s2  ;;  %p1737_p0 = scmp.ne.s32.totalorder %s2647_s0, %s1736_s19 }
   0x3   :  { %2685 = sst [smem:[#allocation40_spill]] %s2650_s3  ;;  %p1740_p1 = scmp.lt.u32.totalorder %s1736_s19, %s2647_s0 }
   0x4   :  { %2686 = sst [smem:[#allocation41_spill]] %s2651_s4 }
   0x5   :  { %2687 = sst [smem:[#allocation42_spill]] %s2652_s5  ;;  %p1742_p2 = pnand %p1740_p1, %p1737_p0 }
   0x6   :  { %2688 = sst [smem:[#allocation43_spill]] %s2653_s6 }
   0x7   :  { %2689 = sst [smem:[#allocation44_spill]] %s2654_s7 }
   0x8   :  { %2690 = sst [smem:[#allocation45_spill]] %s2655_s8 }
   0x9   :  { %2691 = sst [smem:[#allocation46_spill]] %s2656_s9 }
   0xa   :  { %2692 = sst [smem:[#allocation47_spill]] %s2657_s10 }
   0xb   :  { %2693 = sst [smem:[#allocation48_spill]] %s2658_s11 }
   0xc   :  { %1745 = shalt.err (!%p1742_p2)  }
   0xd   :  { %s2038_s24 = smov [#allocation7]  }
   0xe   :  { %17 = dma.hbm_to_smem %s2647_s0, 16, %s2038_s24, [#allocation6] }
   0xf   :  { %1968 = dma.done.wait [#allocation6], 16 }
  0x10   :  { %1969 = vsyncadd [#allocation6], 4294967280 }
  0x11   :  { %19 = sfence }
  0x12   :  { %20 = vsyncpa [#allocation9], 0 }
  0x13   :  { %22 = vsyncpa [#allocation9 + $0x1], 0 }
  0x14   :  { %23 = vsyncpa [#allocation12], 0 }
  0x15   :  { %25 = vsyncpa [#allocation12 + $0x1], 0 }
  0x16   :  { %26 = vsyncpa [#allocation15], 0 }
  0x17   :  { %28 = vsyncpa [#allocation15 + $0x1], 0 }
  0x18   :  { %29 = vsyncpa [#allocation10], 0  ;;  %s2124_s27 = smov 0   ;;  %s2126_s28 = smov 0  }
  0x19   :  { %s2128_s29 = smov 0   ;;  %s2130_s30 = smov 0  }
  0x1a   :  { %s2132_s12 = smov 0   ;;  %s2134_s0 = smov 0  }
  0x1b   :  { %s2136_s13 = smov 0   ;;  %s2138_s14 = smov 0  }
  0x1c   :  { %s2140_s15 = smov 0   ;;  %s2142_s16 = smov 0  }
  0x1d   :  { %s2144_s17 = smov 0  }
  0x1e LB: > { %2694 = sst [smem:[#allocation27_spill]] %s2008_s12  ;;  %p2663_p3 = scmp.eq.s32.totalorder %s2032_s17, 0  ;;  %s2032_s17 = sphi %s2144_s17, %s35_s17   ;;  %s2028_s16 = sphi %s2142_s16, %s2761_s16   ;;  %s2024_s15 = sphi %s2140_s15, %s2760_s15   ;;  %s2020_s14 = sphi %s2138_s14, %s2759_s14   ;;  %s2016_s13 = sphi %s2136_s13, %s2758_s13   ;;  %s2012_s0 = sphi %s2134_s0, %s2757_s0   ;;  %s2008_s12 = sphi %s2132_s12, %s2756_s12   ;;  %s2004_s30 = sphi %s2130_s30, %s2755_s30   ;;  %s2000_s29 = sphi %s2128_s29, %s2764_s29   ;;  %s1996_s28 = sphi %s2126_s28, %s2763_s28   ;;  %s1992_s27 = sphi %s2124_s27, %s2762_s27  }
  0x1f   : > { %2695 = sst [smem:[#allocation28_spill]] %s2012_s0  ;;  %p134_p4 = scmp.ne.s32.totalorder %s2000_s29, %s1996_s28 }
  0x20   : > { %2696 = sst [smem:[#allocation29_spill]] %s2016_s13  ;;  %p2662_p7 = scmp.lt.s32.totalorder %s2032_s17, 4 }
  0x21   : > { %2697 = sst [smem:[#allocation30_spill]] %s2020_s14  ;;  %p136_p6 = por %p134_p4, %p2663_p3 }
  0x22   : > { %2698 = sst [smem:[#allocation31_spill]] %s2024_s15  ;;  %s345_s20 = sand.u32 1, %s2032_s17  }
  0x23   : > { %2699 = sst [smem:[#allocation32_spill]] %s2028_s16  ;;  %s2659_s21 = sand.u32 1, %s2000_s29  }
  0x24   : > { %s2193_s22 = sshll.u32 %s2659_s21, 7  ;;  %s2196_s23 = sshll.u32 %s2028_s16, 11 }
  0x25   : > { %s2700_s5 = sld [smem:[#allocation42_spill]]  ;;  %s349_s19 = scalar_lea.vmem [#allocation11], %s2193_s22 }
  0x26   : > { %s356_s18 = sshll.u32 %s349_s19, 4  ;;  %p2209_p8 = pnand %p2662_p7, %p136_p6  ;;  %s2205_s18 = int_to_ptr.vmem [resolvable:$true] %s356_s18 }
  0x27   : > { %s2215_s11 = scalar_lea.sflag [#allocation12], %s345_s20 }
  0x28   : > { %s2701_s21 = scalar_select %p2209_p8, 1, 0 }
  0x29   : > { %p2221_p12 = pneg %p2209_p8 }
  0x2b   : > { %s2202_s26 = scalar_lea.hbm %s2700_s5, %s2196_s23  ;;  %s1751_s1 = scalar_lea.hbm %s2700_s5, 4096 }
  0x2c   : > { %s1746_s24 = scalar_lea.hbm %s2202_s26, 2048  ;;  %p1752_p1 = scmp.lt.u32.totalorder %s2202_s26, %s2700_s5 }
  0x2d   : > { %p1747_p11 = scmp.ne.s32.totalorder %s2202_s26, %s1746_s24  ;;  %p1753_p2 = scmp.lt.u32.totalorder %s1751_s1, %s1746_s24 }
  0x2e   : > { %p1755_p6 = scmp.lt.u32.totalorder %s1746_s24, %s2202_s26 }
  0x2f   : > { %p1749_p13 = pnand %p2221_p12, %p1747_p11  ;;  %p1754_p4 = por %p1753_p2, %p1752_p1 }
  0x31   : > { %p1750_p0 = pneg %p1749_p13  ;;  %p1756_p7 = por %p1755_p6, %p1754_p4 }
  0x33   : > { %p1757_p5 = pnand %p1756_p7, %p1750_p0 }
  0x35   : > { %1760 = shalt.err (!%p1757_p5)
}
  0x36   : > { %s1761_s20 = scalar_lea.vmem %s2205_s18, 2048  ;;  %s2039_s4 = smov [#allocation11]  }
  0x37   : > { %p1762_p11 = scmp.ne.s32.totalorder %s2205_s18, %s1761_s20  ;;  %s1766_s19 = sshll.u32 %s2039_s4, 4  ;;  %s1767_s19 = int_to_ptr.vmem [resolvable:$false] %s1766_s19 }
  0x38   : > { %s1768_s8 = scalar_lea.vmem %s1767_s19, 4096  ;;  %p1769_p9 = scmp.lt.s32.totalorder %s2205_s18, %s1767_s19 }
  0x39   : > { %p1764_p13 = pnand %p1762_p11, %p2221_p12  ;;  %p1770_p10 = scmp.lt.s32.totalorder %s1768_s8, %s1761_s20 }
  0x3b   : > { %p1765_p3 = pneg %p1764_p13  ;;  %p1771_p1 = por %p1770_p10, %p1769_p9 }
  0x3d   : > { %p1772_p2 = pnand %p1771_p1, %p1765_p3 }
  0x3f   : > { %1775 = shalt.err (!%p1772_p2)
}
  0x40   : > { %s2664_s1 = smov 128   ;;  %s2666_s10 = smov 8  }
  0x41   : > { %1618 = dma.hbm_to_vmem [thread:$0]  (!%p2209_p8), %s2202_s26, 2048, %s2205_s18, %s2215_s11, %s2664_s1, %s2664_s1, %s2666_s10  }
  0x42   : > { %p2703_p3 = scmp.lt.s32.totalorder %s2032_s17, 5  ;;  %p2704_p5 = scmp.ge.s32.totalorder %s2032_s17, 1 }
  0x43   : > { %s2257_s20 = sadd.s32 4294967295, %s2032_s17   ;;  %s44_s4 = sadd.s32 1, %s2024_s15 }
  0x44   : > { %p2252_p7 = pnand %p2704_p5, %p2703_p3  ;;  %2706 = sst [smem:[#allocation33_spill]] %s2257_s20 }
  0x45   : > { %p45_p9 = scmp.ge.s32.totalorder %s44_s4, 2  ;;  %s54_s19 = sadd.s32 1, %s2012_s0 }
  0x46   : > { %s2705_s24 = scalar_select %p2252_p7, 1, 0 }
  0x47   : > { %p61_p10 = scmp.ne.s32.totalorder %s2012_s0, %s2008_s12  ;;  %p67_p0 = scmp.ne.s32.totalorder %s2008_s12, %s2004_s30 }
  0x48   : > { %s2766_s4 = smov (%p45_p9, %s44_s4), 0  ;;  %s2708_s18 = sadd.s32 1, %s2028_s16 }
  0x49   : > { %2707 = sst [smem:[#allocation34_spill]] %s2766_s4  ;;  %s2768_s18 = smov (!%p45_p9, %s2708_s18), %s2028_s16 }
  0x4a   : > { %s51_s26 = ssub.s32 %s2024_s15, %s2766_s4  ;;  %p2709_p4 = scmp.eq.s32.totalorder %s2032_s17, 0 }
  0x4b   : > { %p49_p11 = scmp.ge.s32.totalorder %s2768_s18, 2  ;;  %p52_p13 = scmp.eq.s32.totalorder %s51_s26, 0 }
  0x4c   : > { %p2274_p6 = por %p2709_p4, %p61_p10  ;;  %p68_p1 = scmp.eq.s32.totalorder %s2257_s20, 0 }
  0x4d   : > { %s318_s30 = sand.u32 1, %s2012_s0   ;;  %s2770_s18 = smov (%p49_p11, %s2768_s18), 0 }
  0x4e   : > { %2711 = sst [smem:[#allocation35_spill]] %s2770_s18  ;;  %p2285_p2 = por %p68_p1, %p67_p0 }
  0x4f   : > { %s2283_s1 = scalar_select %p52_p13, %s2012_s0, %s54_s19  }
  0x50   : > { %s2713_s10 = scalar_select %p2285_p2, 1, 0 }
  0x51   : > { %2712 = sst [smem:[#allocation36_spill]] %s2283_s1  ;;  %s124_s5 = ssub.s32 %s2028_s16, %s2770_s18 }
  0x52   : > { %p125_p3 = scmp.eq.s32.totalorder %s124_s5, 0  ;;  %p2714_p5 = scmp.ne.s32.totalorder %s1996_s28, %s1992_s27 }
  0x53   : > { %s1274_s4 = sshll.u32 %s318_s30, 4  ;;  %s2716_s6 = sadd.s32 1, %s2000_s29 }
  0x54   : > { %p2294_p9 = por %p2714_p5, %p68_p1  ;;  %s1310_s14 = sshll.u32 %s2024_s15, 8 }
  0x55   : > { %s2301_s3 = scalar_select %p125_p3, %s2000_s29, %s2716_s6  }
  0x56   : > { %s2715_s26 = scalar_select %p2294_p9, 1, 0 }
  0x57   : > { %2717 = sst [smem:[#allocation37_spill]] %s2301_s3  ;;  %s2718_s2 = sld [smem:[#allocation39_spill]] }
  0x58   : > { %s322_s18 = scalar_lea.vmem [#allocation8], %s1274_s4  ;;  %p2719_p10 = scmp.lt.s32.totalorder %s2032_s17, 4 }
  0x59   : > { %s329_s5 = sshll.u32 %s322_s18, 4  ;;  %s2721_s7 = sld [smem:[#allocation44_spill]]  ;;  %s2309_s5 = int_to_ptr.vmem [resolvable:$true] %s329_s5 }
  0x5a   : > { %p2315_p0 = pnand %p2719_p10, %p2274_p6  ;;  %s2328_s4 = scalar_lea.sflag [#allocation9], %s318_s30 }
  0x5c   : > { %p1778_p11 = pneg %p2315_p0 }
  0x5d   : > { %s2307_s19 = scalar_lea.hbm %s2718_s2, %s1310_s14  ;;  %s376_s14 = scalar_lea.vmem [#allocation13], %s2193_s22 }
  0x5e   : > { %s2326_s20 = sshll.u32 %s376_s14, 4  ;;  %s1776_s18 = scalar_lea.hbm %s2307_s19, 256  ;;  %s2360_s20 = int_to_ptr.vmem [resolvable:$true] %s2326_s20 }
  0x5f   : > { %s2323_s13 = scalar_lea.hbm %s2721_s7, %s2196_s23  ;;  %p1777_p4 = scmp.ne.s32.totalorder %s2307_s19, %s1776_s18 }
  0x60   : > { %s1781_s16 = scalar_lea.hbm %s2718_s2, 512  ;;  %p1782_p1 = scmp.lt.u32.totalorder %s2307_s19, %s2718_s2 }
  0x61   : > { %p1779_p6 = pnand %p1778_p11, %p1777_p4  ;;  %p1783_p3 = scmp.lt.u32.totalorder %s1781_s16, %s1776_s18 }
  0x62   : > { %p1785_p10 = scmp.lt.u32.totalorder %s1776_s18, %s2307_s19 }
  0x63   : > { %p1780_p13 = pneg %p1779_p6  ;;  %p1784_p5 = por %p1783_p3, %p1782_p1 }
  0x65   : > { %p1786_p9 = por %p1785_p10, %p1784_p5 }
  0x67   : > { %p1787_p2 = pnand %p1786_p9, %p1780_p13 }
  0x69   : > { %1790 = shalt.err (!%p1787_p2)
}
  0x6a   : > { %s1791_s30 = scalar_lea.vmem %s2309_s5, 256  ;;  %s2042_s15 = smov [#allocation8]  }
  0x6b   : > { %p1792_p4 = scmp.ne.s32.totalorder %s2309_s5, %s1791_s30  ;;  %s1796_s14 = sshll.u32 %s2042_s15, 4  ;;  %s1797_s14 = int_to_ptr.vmem [resolvable:$false] %s1796_s14 }
  0x6c   : > { %s1798_s1 = scalar_lea.vmem %s1797_s14, 512  ;;  %p1799_p8 = scmp.lt.s32.totalorder %s2309_s5, %s1797_s14 }
  0x6d   : > { %p1794_p6 = pnand %p1792_p4, %p1778_p11  ;;  %p1800_p1 = scmp.lt.s32.totalorder %s1798_s1, %s1791_s30 }
  0x6f   : > { %p1795_p7 = pneg %p1794_p6  ;;  %p1801_p3 = por %p1800_p1, %p1799_p8 }
  0x71   : > { %p1802_p5 = pnand %p1801_p3, %p1795_p7 }
  0x73   : > { %1805 = shalt.err (!%p1802_p5)
}
  0x74   : > { %s2722_s18 = smov 8   ;;  %s2723_s8 = smov 128  }
  0x75   : > { %1615 = dma.hbm_to_vmem [thread:$0]  (!%p2315_p0), %s2307_s19, 256, %s2309_s5, %s2328_s4, %s2723_s8, %s2723_s8, %s2722_s18  }
  0x76   : > { %s1806_s16 = scalar_lea.hbm %s2323_s13, 2048  ;;  %s1811_s30 = scalar_lea.hbm %s2721_s7, 4096 }
  0x77   : > { %p1807_p8 = scmp.ne.s32.totalorder %s2323_s13, %s1806_s16  ;;  %p1812_p9 = scmp.lt.u32.totalorder %s2323_s13, %s2721_s7 }
  0x78   : > { %p1813_p11 = scmp.lt.u32.totalorder %s1811_s30, %s1806_s16  ;;  %p1815_p10 = scmp.lt.u32.totalorder %s1806_s16, %s2323_s13 }
  0x79   : > { %p1809_p7 = pnand %p1807_p8, %p2221_p12 }
  0x7a   : > { %p1814_p13 = por %p1813_p11, %p1812_p9 }
  0x7b   : > { %p1810_p2 = pneg %p1809_p7 }
  0x7c   : > { %p1816_p4 = por %p1815_p10, %p1814_p13 }
  0x7e   : > { %p1817_p0 = pnand %p1816_p4, %p1810_p2 }
  0x80   : > { %1820 = shalt.err (!%p1817_p0)
}
  0x81   : > { %s1821_s19 = scalar_lea.vmem %s2360_s20, 2048  ;;  %s2043_s5 = smov [#allocation13]  }
  0x82   : > { %p1822_p6 = scmp.ne.s32.totalorder %s2360_s20, %s1821_s19  ;;  %s1826_s4 = sshll.u32 %s2043_s5, 4  ;;  %s1827_s4 = int_to_ptr.vmem [resolvable:$false] %s1826_s4 }
  0x83   : > { %s1828_s1 = scalar_lea.vmem %s1827_s4, 4096  ;;  %p1829_p5 = scmp.lt.s32.totalorder %s2360_s20, %s1827_s4 }
  0x84   : > { %p1824_p1 = pnand %p1822_p6, %p2221_p12  ;;  %p1830_p8 = scmp.lt.s32.totalorder %s1828_s1, %s1821_s19 }
  0x86   : > { %p1825_p3 = pneg %p1824_p1  ;;  %p1831_p7 = por %p1830_p8, %p1829_p5 }
  0x88   : > { %p1832_p9 = pnand %p1831_p7, %p1825_p3 }
  0x8a   : > { %1835 = shalt.err (!%p1832_p9)
}
  0x8b   : > { %p2724_p2 = scmp.ne.s32.totalorder %s2701_s21, 0  ;;  %s2725_s9 = sld [smem:[#allocation46_spill]] }
  0x8c   : > { %s403_s30 = scalar_lea.vmem [#allocation14], %s2193_s22  ;;  %s2726_s14 = sand.u32 1, %s2000_s29  }
  0x8d   : > { %1621 = dma.hbm_to_vmem [thread:$0]  (!%p2724_p2), %s2323_s13, 2048, %s2360_s20, %s2215_s11, %s2723_s8, %s2723_s8, %s2722_s18  }
  0x8e   : > { %s410_s15 = sshll.u32 %s403_s30, 4  ;;  %s2398_s19 = scalar_lea.sflag [#allocation15], %s2726_s14  ;;  %s2394_s15 = int_to_ptr.vmem [resolvable:$true] %s410_s15 }
  0x91   : > { %s2391_s6 = scalar_lea.hbm %s2725_s9, %s2196_s23  ;;  %s1841_s23 = scalar_lea.hbm %s2725_s9, 4096 }
  0x92   : > { %s1836_s5 = scalar_lea.hbm %s2391_s6, 2048  ;;  %p1842_p4 = scmp.lt.u32.totalorder %s2391_s6, %s2725_s9 }
  0x93   : > { %p1837_p11 = scmp.ne.s32.totalorder %s2391_s6, %s1836_s5  ;;  %p1843_p0 = scmp.lt.u32.totalorder %s1841_s23, %s1836_s5 }
  0x94   : > { %p1845_p1 = scmp.lt.u32.totalorder %s1836_s5, %s2391_s6 }
  0x95   : > { %p1839_p13 = pnand %p1837_p11, %p2221_p12  ;;  %p1844_p6 = por %p1843_p0, %p1842_p4 }
  0x97   : > { %p1840_p10 = pneg %p1839_p13  ;;  %p1846_p3 = por %p1845_p1, %p1844_p6 }
  0x99   : > { %p1847_p5 = pnand %p1846_p3, %p1840_p10 }
  0x9b   : > { %1850 = shalt.err (!%p1847_p5)
}
  0x9c   : > { %s1851_s22 = scalar_lea.vmem %s2394_s15, 2048  ;;  %s2044_s1 = smov [#allocation14]  }
  0x9d   : > { %p1852_p8 = scmp.ne.s32.totalorder %s2394_s15, %s1851_s22  ;;  %s1856_s16 = sshll.u32 %s2044_s1, 4  ;;  %s1857_s16 = int_to_ptr.vmem [resolvable:$false] %s1856_s16 }
  0x9e   : > { %s1858_s27 = scalar_lea.vmem %s1857_s16, 4096  ;;  %p1859_p11 = scmp.lt.s32.totalorder %s2394_s15, %s1857_s16 }
  0x9f   : > { %p1854_p7 = pnand %p1852_p8, %p2221_p12  ;;  %p1860_p13 = scmp.lt.s32.totalorder %s1858_s27, %s1851_s22 }
  0xa1   : > { %p1855_p9 = pneg %p1854_p7  ;;  %p1861_p4 = por %p1860_p13, %p1859_p11 }
  0xa3   : > { %p1862_p0 = pnand %p1861_p4, %p1855_p9 }
  0xa5   : > { %1865 = shalt.err (!%p1862_p0)
}
  0xa6   : > { %1624 = dma.hbm_to_vmem [thread:$0]  (!%p2724_p2), %s2391_s6, 2048, %s2394_s15, %s2398_s19, %s2723_s8, %s2723_s8, %s2722_s18  }
  0xa7   : > { %p2727_p12 = scmp.ne.s32.totalorder %s2705_s24, 0 }
  0xa8   : > { %s430_s25 = sand.u32 (!%p2727_p12), 1, %s2008_s12   ;;  %p2728_p10 = scmp.ne.s32.totalorder (!%p2727_p12), %s2713_s10, 0 }
  0xa9   : > { %428 = sbr.rel (%p2727_p12) target bundleno = 1439 (0x59f), region = 56  ;;  %s2428_s30 = sshll.u32 (!%p2727_p12), %s430_s25, 4 }
  0xaa   : > { %s431_s14 = scalar_lea.sflag (!%p2727_p12), [#allocation9], %s430_s25 }
  0xb0   : > { %1971 = dma.done.wait (%p2728_p10), %s431_s14, 256  }
  0xb1   : > { %1973 = vsyncadd (%p2728_p10), %s431_s14, 4294967040  ;;  %s2729_s21 = sld [smem:[#allocation33_spill]]  ;;  %s441_s8 = sand.u32 1, %s1996_s28  }
  0xb2   : > { %s1288_s24 = sshll.u32 %s441_s8, 7  ;;  %p2730_p2 = scmp.ne.s32.totalorder %s2715_s26, 0 }
  0xb3   : > { %s2437_s15 = scalar_lea.vmem [#allocation11], %s1288_s24 }
  0xb7   : > { %s439_s18 = sand.u32 1, %s2729_s21  }
  0xb8   : > { %s440_s6 = scalar_lea.sflag [#allocation12], %s439_s18 }
  0xb9   : > { %1975 = dma.done.wait (%p2730_p2), %s440_s6, 4096  }
  0xba   : > { %1977 = vsyncadd (%p2730_p2), %s440_s6, 4294963200  ;;  %s2443_s19 = scalar_lea.vmem [#allocation13], %s1288_s24  ;;  %s458_s11 = scalar_lea.sflag [#allocation15], %s441_s8 }
  0xbb   : > { %s2445_s10 = scalar_lea.vmem [#allocation14], %s1288_s24 }
  0xbc   : > { %1979 = dma.done.wait (%p2730_p2), %s458_s11, 2048  }
  0xbd   : > { %1981 = vsyncadd (%p2730_p2), %s458_s11, 4294965248  ;;  %s2731_s13 = sld [smem:[#allocation29_spill]]  ;;  %s2732_s23 = sld [smem:[#allocation30_spill]] }
  0xbe   : > { %s2735_s14 = sld [smem:[#allocation43_spill]]  ;;  %s2736_s24 = sld [smem:[#allocation45_spill]] }
  0xbf   : > { %s2737_s4 = sld [smem:[#allocation47_spill]]  ;;  %s2045_s2 = smov [#allocation2]  }
  0xc0   : > { %s544_s7 = sshll.u32 %s2045_s2, 4  ;;  %s2738_s9 = sld [smem:[#allocation38_spill]]  ;;  %s545_s7 = int_to_ptr.vmem [resolvable:$true] %s544_s7 }
  0xc3   : > { %p519_p6 = scmp.lt.s32.totalorder %s2731_s13, 1  ;;  %p522_p1 = scmp.lt.s32.totalorder %s2732_s23, 1 }
  0xc4   : > { %p531_p3 = scmp.eq.s32.totalorder %s2732_s23, 0  ;;  %p532_p5 = scmp.eq.s32.totalorder %s2731_s13, 0 }
  0xc5   : > { %s2456_s20 = scalar_select %p519_p6, %s2731_s13, 1 }
  0xc6   : > { %s2772_s23 = smov (!%p522_p1, %s2732_s23), 1  ;;  %p2465_p8 = pnand %p532_p5, %p531_p3 }
  0xc7   : > { %s524_s21 = scalar_lea.vmem %s2735_s14, %s2772_s23  ;;  %s527_s6 = scalar_lea.vmem %s2736_s24, %s2772_s23 }
  0xc8   : > { %s530_s22 = scalar_lea.vmem %s2737_s4, %s2772_s23  ;;  %s1866_s0 = scalar_lea.hbm %s2738_s9, 256 }
  0xc9   : > { %p1867_p7 = scmp.ne.s32.totalorder %s2738_s9, %s1866_s0  ;;  %p1868_p9 = pneg %p2465_p8 }
  0xca   : > { %p1873_p4 = scmp.lt.u32.totalorder %s1866_s0, %s2738_s9 }
  0xcb   : > { %p1869_p11 = pnand %p1868_p9, %p1867_p7 }
  0xcd   : > { %p1870_p13 = pneg %p1869_p11 }
  0xcf   : > { %p1875_p0 = pnand %p1873_p4, %p1870_p13 }
  0xd1   : > { %1878 = shalt.err (!%p1875_p0)  }
  0xd2   : > { %s1879_s2 = scalar_lea.vmem %s545_s7, 256  ;;  %p1887_p6 = scmp.lt.s32.totalorder %s545_s7, %s545_s7 }
  0xd3   : > { %p1880_p12 = scmp.ne.s32.totalorder %s545_s7, %s1879_s2  ;;  %p1888_p1 = scmp.lt.s32.totalorder %s1879_s2, %s1879_s2 }
  0xd5   : > { %p1882_p10 = pnand %p1880_p12, %p1868_p9  ;;  %p1889_p3 = por %p1888_p1, %p1887_p6 }
  0xd7   : > { %p1883_p2 = pneg %p1882_p10 }
  0xd9   : > { %p1890_p5 = pnand %p1889_p3, %p1883_p2 }
  0xdb   : > { %1893 = shalt.err (!%p1890_p5)  }
  0xdc   : > { %1606 = dma.hbm_to_vmem [thread:$0]  (!%p2465_p8), %s2738_s9, 256, %s545_s7, [#allocation5] }
  0xdd   : > { %1983 = dma.done.wait (!%p2465_p8), [#allocation5], 256 }
  0xde   : > { %1985 = vsyncadd (!%p2465_p8), [#allocation5], 4294967040  ;;  %p1291_p7 = scmp.ne.s32.totalorder %s2731_s13, 0 }
  0xdf   : > { %v2046_v0 = vmov (!%p1291_p7), 0.0  }
  0xe0   : > { %553 = sbr.rel (%p1291_p7) target bundleno = 231 (0xe7), region = 84  ;;  %554 = vst [vmem:[#allocation3] sm:$0xff] (!%p1291_p7), %v2046_v0  ;;  %555 = vst [vmem:[#allocation3 + $0x8] sm:$0xff] (!%p1291_p7), %v2046_v0 }
  0xe7 PF: > { %v558_v1 = vld [vmem:[%s2437_s15] sm:$0xff]  ;;  %v559_v2 = vld [vmem:[%s2437_s15 + $0x8] sm:$0xff]  ;;  %v560_v3 = vld [vmem:[%s2437_s15 + $0x10] sm:$0xff]  ;;  %s2739_s7 = scalar_lea.vmem [#allocation8], %s2428_s30  ;;  %s2740_s0 = sld [smem:[#allocation29_spill]] }
  0xe8   : > { %v1494_v4 = vpack.c.bf16 %v559_v2, %v558_v1  ;;  %v561_v5 = vld [vmem:[%s2437_s15 + $0x18] sm:$0xff]  ;;  %v562_v7 = vld [vmem:[%s2437_s15 + $0x20] sm:$0xff]  ;;  %v563_v8 = vld [vmem:[%s2437_s15 + $0x28] sm:$0xff]  ;;  %s2741_s5 = smov %s2739_s7 }
  0xe9   : > { %v1498_v6 = vpack.c.bf16 %v561_v5, %v560_v3  ;;  %v1502_v9 = vpack.c.bf16 %v563_v8, %v562_v7  ;;  %v556_v10 = vld [vmem:[%s2739_s7] sm:$0xff]  ;;  %v565_v12 = vld [vmem:[%s2437_s15 + $0x38] sm:$0xff]  ;;  %v567_v15 = vld [vmem:[%s2437_s15 + $0x48] sm:$0xff] }
  0xea   : > { %1495 = vmatprep.subr.bf16.mxu0 %v1494_v4  ;;  %v564_v11 = vld [vmem:[%s2437_s15 + $0x30] sm:$0xff]  ;;  %1407 = vmatprep.mubr.f32.mxu0 %v556_v10  ;;  %v566_v14 = vld [vmem:[%s2437_s15 + $0x40] sm:$0xff]  ;;  %v569_v18 = vld [vmem:[%s2437_s15 + $0x58] sm:$0xff] }
  0xeb   : > { %1497 = vmatpush3.bf16.msra.mxu0 %v1494_v4  ;;  %v1506_v13 = vpack.c.bf16 %v565_v12, %v564_v11  ;;  %v1510_v16 = vpack.c.bf16 %v567_v15, %v566_v14  ;;  %v568_v17 = vld [vmem:[%s2437_s15 + $0x50] sm:$0xff]  ;;  %v570_v20 = vld [vmem:[%s2437_s15 + $0x60] sm:$0xff]  ;;  %v571_v21 = vld [vmem:[%s2437_s15 + $0x68] sm:$0xff] }
  0xec   : > { %1499 = vmatprep.subr.bf16.mxu0 %v1498_v6  ;;  %v1514_v19 = vpack.c.bf16 %v569_v18, %v568_v17  ;;  %v1518_v22 = vpack.c.bf16 %v571_v21, %v570_v20  ;;  %v572_v23 = vld [vmem:[%s2437_s15 + $0x70] sm:$0xff]  ;;  %v573_v24 = vld [vmem:[%s2437_s15 + $0x78] sm:$0xff]  ;;  %s2034_s15 = smov 0  }
  0xed   : > { %v1522_v25 = vpack.c.bf16 %v573_v24, %v572_v23  ;;  %v557_v26 = vld [vmem:[%s2741_s5 + $0x8] sm:$0xff]  ;;  %s1293_s13 = sshll.u32 %s2740_s0, 4  ;;  %v1292_v27 = vld [vmem:[%s524_s21] ss:$0 sm:$0xff] }
  0xef   : > { %1501 = vmatpush3.bf16.msra.mxu0 %v1498_v6 }
  0xf0   : > { %1503 = vmatprep.subr.bf16.mxu0 %v1502_v9 }
  0xf3   : > { %1505 = vmatpush3.bf16.msra.mxu0 %v1502_v9 }
  0xf4   : > { %1507 = vmatprep.subr.bf16.mxu0 %v1506_v13 }
  0xf7   : > { %1509 = vmatpush3.bf16.msra.mxu0 %v1506_v13 }
  0xf8   : > { %1511 = vmatprep.subr.bf16.mxu0 %v1510_v16 }
  0xfb   : > { %1513 = vmatpush3.bf16.msra.mxu0 %v1510_v16 }
  0xfc   : > { %1515 = vmatprep.subr.bf16.mxu0 %v1514_v19 }
  0xff   : > { %1517 = vmatpush3.bf16.msra.mxu0 %v1514_v19 }
 0x100   : > { %1519 = vmatprep.subr.bf16.mxu0 %v1518_v22 }
 0x103   : > { %1521 = vmatpush3.bf16.msra.mxu0 %v1518_v22 }
 0x104   : > { %1523 = vmatprep.subr.bf16.mxu0 %v1522_v25 }
 0x107   : > { %1525 = vmatpush3.bf16.msra.mxu0 %v1522_v25 }
 0x10a   : > { %1408 = vmatmul.mubr.f32.vlgmr.msra.gmra.mrb[0].mxu0 %v557_v26 }
 0x1dd   : > { %v1409_v28 = vpop.f32.mrb[0].mxu0 }
 0x1de   : > { %v653_v29 = vadd.f32 %v1409_v28, %v1292_v27  ;;  %v647_v30 = vpop.f32.mrb[1].mxu0 }
 0x1df   : > { %v648_v31 = vadd.f32 %v1292_v27, %v647_v30 }
 0x1e0 LB: >> { %s663_s18 = sadd.s32 %s2036_s15, %s1293_s13  ;;  %s669_s24 = scalar_lea.vmem [#allocation4], %s2036_s15  ;;  %s2036_s15 = sphi %s2034_s15, %s662_s15  }
 0x1e1   : >> { %s664_s8 = sld [smem:[#allocation7 + %s663_s18]]  ;;  %s662_s15 = sadd.s32 1, %s2036_s15  }
 0x1e2   : >> { %p659_p9 = scmp.ge.s32.totalorder %s662_s15, 16  }
 0x1e3   : > { %v677_v35 = vlaneseq (%p659_p9)  ;;  %s2743_s4 = sld [smem:[#allocation40_spill]] (%p659_p9)  ;;  %s2745_s27 = sld [smem:[#allocation29_spill]] (%p659_p9)  ;;  %vm693_vm0 = vcmask (%p659_p9), 130048   ;;  %v2047_v44 = vmov (%p659_p9), 0.0   ;;  %v692_v47 = vld [vmem:[#allocation3 + $0x8] sm:$0xff] (%p659_p9)  ;;  %v691_v48 = vld [vmem:[#allocation3] sm:$0xff] (%p659_p9) }
 0x1e5   : > { %v2533_v39 = vshrl.u32 (%p659_p9), %v677_v35, 7 }
 0x1e6   : > { %661 = sbr.rel (!%p659_p9) target bundleno = 480 (0x1e0), region = 171 }
 0x1e7   : >> { %p665_p8 = scmp.lt.s32.totalorder %s664_s8, 15  ;;  %v679_v42 = vadd.s32 (%p659_p9), 8, %v2533_v39 }
 0x1e9   : >> { %s2774_s8 = smov (!%p665_p8, %s664_s8), 15  ;;  %s2744_s1 = scalar_lea.vmem (%p659_p9), %s2743_s4, %s2456_s20 }
 0x1ea   : >> { %s667_s30 = scalar_lea.vmem [#allocation2], %s2774_s8  ;;  %v1294_v38 = vld [vmem:[%s2744_s1] ss:$0 sm:$0xff] (%p659_p9)  ;;  %p779_p11 = scmp.eq.s32.totalorder (%p659_p9), %s2745_s27, 1 }
 0x1eb   : >> { %v668_v32 = vld [vmem:[%s667_s30] sm:$0x1]  ;;  %vm685_vm1 = vcmp.eq.s32.totalorder (%p659_p9), %v1294_v38, %v2533_v39  ;;  %vm686_vm2 = vcmp.eq.s32.totalorder (%p659_p9), %v1294_v38, %v679_v42  ;;  %p1299_p13 = scmp.ne.s32.totalorder (%p659_p9), %s2745_s27, 1 }
 0x1ec   : >> { %670 = vst [vmem:[%s669_s24] sm:$0x1] %v668_v32  ;;  %v1295_v45 = vsel (%p659_p9), %vm685_vm1, 1.0, %v2047_v44  ;;  %v1296_v46 = vsel (%p659_p9), %vm686_vm2, 1.0, %v2047_v44 }
 0x1ed   : > { %1414 = vmatprep.mubr.msk.f32.mxu1 %vm693_vm0, %v1295_v45  ;;  %v789_v53 = vld [vmem:[%s2443_s19] sm:$0xff] (!%p1299_p13)  ;;  %v790_v54 = vld [vmem:[%s2443_s19 + $0x8] sm:$0xff] (!%p1299_p13)  ;;  %v791_v55 = vld [vmem:[%s2443_s19 + $0x10] sm:$0xff] (!%p1299_p13) }
 0x1ee   : > { %v1530_v56 = vpack.c.bf16 (!%p1299_p13), %v790_v54, %v789_v53  ;;  %v792_v57 = vld [vmem:[%s2443_s19 + $0x18] sm:$0xff] (!%p1299_p13)  ;;  %v793_v59 = vld [vmem:[%s2443_s19 + $0x20] sm:$0xff] (!%p1299_p13)  ;;  %v794_v60 = vld [vmem:[%s2443_s19 + $0x28] sm:$0xff] (!%p1299_p13) }
 0x1ef   : > { %v1534_v58 = vpack.c.bf16 (!%p1299_p13), %v792_v57, %v791_v55  ;;  %v1538_v61 = vpack.c.bf16 (!%p1299_p13), %v794_v60, %v793_v59  ;;  %v785_v63 = vld [vmem:[#allocation2] sm:$0xff] (!%p1299_p13)  ;;  %v796_v1 = vld [vmem:[%s2443_s19 + $0x38] sm:$0xff] (!%p1299_p13)  ;;  %v889_v3 = vld [vmem:[%s2445_s10] sm:$0xff] (!%p1299_p13) }
 0x1f0   : > { %1531 = vmatprep.subr.bf16.mxu0 (!%p1299_p13), %v1530_v56  ;;  %v795_v0 = vld [vmem:[%s2443_s19 + $0x30] sm:$0xff] (!%p1299_p13)  ;;  %v890_v4 = vld [vmem:[%s2445_s10 + $0x8] sm:$0xff] (!%p1299_p13)  ;;  %v892_v6 = vld [vmem:[%s2445_s10 + $0x18] sm:$0xff] (!%p1299_p13) }
 0x1f1   : > { %1533 = vmatpush3.bf16.msra.mxu0 (!%p1299_p13), %v1530_v56  ;;  %v891_v5 = vld [vmem:[%s2445_s10 + $0x10] sm:$0xff] (!%p1299_p13)  ;;  %v1562_v7 = vpack.c.bf16 (!%p1299_p13), %v890_v4, %v889_v3  ;;  %v1542_v9 = vpack.c.bf16 (!%p1299_p13), %v796_v1, %v795_v0  ;;  %v893_v10 = vld [vmem:[%s2445_s10 + $0x20] sm:$0xff] (!%p1299_p13)  ;;  %v894_v11 = vld [vmem:[%s2445_s10 + $0x28] sm:$0xff] (!%p1299_p13) }
 0x1f2   : > { %1535 = vmatprep.subr.bf16.mxu0 (!%p1299_p13), %v1534_v58  ;;  %v1566_v8 = vpack.c.bf16 (!%p1299_p13), %v892_v6, %v891_v5  ;;  %v797_v12 = vld [vmem:[%s2443_s19 + $0x40] sm:$0xff] (!%p1299_p13)  ;;  %v798_v13 = vld [vmem:[%s2443_s19 + $0x48] sm:$0xff] (!%p1299_p13)  ;;  %v1570_v14 = vpack.c.bf16 (!%p1299_p13), %v894_v11, %v893_v10  ;;  %v895_v16 = vld [vmem:[%s2445_s10 + $0x30] sm:$0xff] (!%p1299_p13) }
 0x1f3   : > { %v671_v33 = vld [vmem:[#allocation4] sm:$0xff]  ;;  %v672_v34 = vld [vmem:[#allocation4 + $0x8] sm:$0xff]  ;;  %v1546_v15 = vpack.c.bf16 (!%p1299_p13), %v798_v13, %v797_v12  ;;  %v897_v22 = vld [vmem:[%s2445_s10 + $0x40] sm:$0xff] (!%p1299_p13) }
 0x1f4   : > { %v673_v36 = vadd.f32 %v671_v33, %v648_v31  ;;  %v674_v37 = vadd.f32 %v672_v34, %v653_v29  ;;  %v896_v17 = vld [vmem:[%s2445_s10 + $0x38] sm:$0xff] (!%p1299_p13)  ;;  %v799_v18 = vld [vmem:[%s2443_s19 + $0x50] sm:$0xff] (!%p1299_p13)  ;;  %v898_v23 = vld [vmem:[%s2445_s10 + $0x48] sm:$0xff] (!%p1299_p13) }
 0x1f5   : > { %1537 = vmatpush3.bf16.msra.mxu0 (!%p1299_p13), %v1534_v58  ;;  %v800_v19 = vld [vmem:[%s2443_s19 + $0x58] sm:$0xff] (!%p1299_p13)  ;;  %v1574_v20 = vpack.c.bf16 (!%p1299_p13), %v896_v17, %v895_v16  ;;  %v801_v24 = vld [vmem:[%s2443_s19 + $0x60] sm:$0xff] (!%p1299_p13)  ;;  %v802_v25 = vld [vmem:[%s2443_s19 + $0x68] sm:$0xff] (!%p1299_p13)  ;;  %v1578_v26 = vpack.c.bf16 (!%p1299_p13), %v898_v23, %v897_v22 }
 0x1f6   : > { %v675_v40 = vmax.f32 %v673_v36, 0.0  ;;  %v676_v41 = vmax.f32 %v674_v37, 0.0  ;;  %1539 = vmatprep.subr.bf16.mxu0 (!%p1299_p13), %v1538_v61  ;;  %v1550_v21 = vpack.c.bf16 (!%p1299_p13), %v800_v19, %v799_v18  ;;  %v1554_v27 = vpack.c.bf16 (!%p1299_p13), %v802_v25, %v801_v24  ;;  %v899_v28 = vld [vmem:[%s2445_s10 + $0x50] sm:$0xff] (!%p1299_p13)  ;;  %v900_v29 = vld [vmem:[%s2445_s10 + $0x58] sm:$0xff] (!%p1299_p13)  ;;  %v901_v34 = vld [vmem:[%s2445_s10 + $0x60] sm:$0xff] (!%p1299_p13) }
 0x1f7   : > { %v803_v30 = vld [vmem:[%s2443_s19 + $0x70] sm:$0xff] (!%p1299_p13)  ;;  %v804_v31 = vld [vmem:[%s2443_s19 + $0x78] sm:$0xff] (!%p1299_p13)  ;;  %v1582_v32 = vpack.c.bf16 (!%p1299_p13), %v900_v29, %v899_v28  ;;  %v902_v35 = vld [vmem:[%s2445_s10 + $0x68] sm:$0xff] (!%p1299_p13) }
 0x1f8   : > { %v1526_v43 = vpack.c.bf16 %v676_v41, %v675_v40  ;;  %v1558_v33 = vpack.c.bf16 (!%p1299_p13), %v804_v31, %v803_v30  ;;  %v786_v37 = vld [vmem:[#allocation2 + $0x8] sm:$0xff] (!%p1299_p13)  ;;  %v1586_v38 = vpack.c.bf16 (!%p1299_p13), %v902_v35, %v901_v34  ;;  %v903_v41 = vld [vmem:[%s2445_s10 + $0x70] sm:$0xff] (!%p1299_p13) }
 0x1f9   : > { %1541 = vmatpush3.bf16.msra.mxu0 (!%p1299_p13), %v1538_v61  ;;  %v904_v42 = vld [vmem:[%s2445_s10 + $0x78] sm:$0xff] (!%p1299_p13)  ;;  %v1300_v44 = vld [vmem:[%s527_s6] ss:$0 sm:$0xff] (!%p1299_p13) }
 0x1fa   : > { %1527 = vmatprep.subr.bf16.mxu1 %v1526_v43  ;;  %1543 = vmatprep.subr.bf16.mxu0 (!%p1299_p13), %v1542_v9 }
 0x1fb   : > { %1529 = vmatpush3.bf16.msra.mxu1 %v1526_v43  ;;  %v1590_v43 = vpack.c.bf16 (!%p1299_p13), %v904_v42, %v903_v41 }
 0x1fc   : > { %1563 = vmatprep.subr.bf16.mxu1 (!%p1299_p13), %v1562_v7 }
 0x1fd   : > { %1545 = vmatpush3.bf16.msra.mxu0 (!%p1299_p13), %v1542_v9 }
 0x1fe   : > { %1415 = vmatmul.mubr.msk.f32.vlgmr.msra.gmra.mrb[0].mxu1 %vm693_vm0, %v1296_v46  ;;  %1547 = vmatprep.subr.bf16.mxu0 (!%p1299_p13), %v1546_v15 }
 0x1ff   : > { %1565 = vmatpush3.bf16.msra.mxu1 (!%p1299_p13), %v1562_v7 }
 0x200   : > { %1567 = vmatprep.subr.bf16.mxu1 (!%p1299_p13), %v1566_v8 }
 0x201   : > { %1549 = vmatpush3.bf16.msra.mxu0 (!%p1299_p13), %v1546_v15 }
 0x202   : > { %1551 = vmatprep.subr.bf16.mxu0 (!%p1299_p13), %v1550_v21 }
 0x203   : > { %1569 = vmatpush3.bf16.msra.mxu1 (!%p1299_p13), %v1566_v8 }
 0x204   : > { %1571 = vmatprep.subr.bf16.mxu1 (!%p1299_p13), %v1570_v14 }
 0x205   : > { %1553 = vmatpush3.bf16.msra.mxu0 (!%p1299_p13), %v1550_v21 }
 0x206   : > { %1555 = vmatprep.subr.bf16.mxu0 (!%p1299_p13), %v1554_v27 }
 0x207   : > { %1573 = vmatpush3.bf16.msra.mxu1 (!%p1299_p13), %v1570_v14 }
 0x208   : > { %1575 = vmatprep.subr.bf16.mxu1 (!%p1299_p13), %v1574_v20 }
 0x209   : > { %1557 = vmatpush3.bf16.msra.mxu0 (!%p1299_p13), %v1554_v27 }
 0x20a   : > { %1559 = vmatprep.subr.bf16.mxu0 (!%p1299_p13), %v1558_v33 }
 0x20b   : > { %1577 = vmatpush3.bf16.msra.mxu1 (!%p1299_p13), %v1574_v20 }
 0x20c   : > { %1579 = vmatprep.subr.bf16.mxu1 (!%p1299_p13), %v1578_v26 }
 0x20d   : > { %1561 = vmatpush3.bf16.msra.mxu0 (!%p1299_p13), %v1558_v33 }
 0x20f   : > { %1581 = vmatpush3.bf16.msra.mxu1 (!%p1299_p13), %v1578_v26 }
 0x210   : > { %1583 = vmatprep.subr.bf16.mxu1 (!%p1299_p13), %v1582_v32 }
 0x213   : > { %1585 = vmatpush3.bf16.msra.mxu1 (!%p1299_p13), %v1582_v32 }
 0x214   : > { %1587 = vmatprep.subr.bf16.mxu1 (!%p1299_p13), %v1586_v38 }
 0x217   : > { %1589 = vmatpush3.bf16.msra.mxu1 (!%p1299_p13), %v1586_v38 }
 0x218   : > { %1591 = vmatprep.subr.bf16.mxu1 (!%p1299_p13), %v1590_v43 }
 0x21b   : > { %1593 = vmatpush3.bf16.msra.mxu1 (!%p1299_p13), %v1590_v43 }
 0x2cf   : > { %782 = sbr.rel (%p1299_p13) target bundleno = 1172 (0x494), region = 95 }
 0x2d1   : > { %v1416_v49 = vpop.f32.mrb[0].mxu1 }
 0x2d2   : > { %v776_v50 = vadd.f32 %v1416_v49, %v692_v47  ;;  %v766_v51 = vpop.f32.mrb[1].mxu1 }
 0x2d3   : > { %v775_v52 = vadd.f32 %v766_v51, %v691_v48  ;;  %v1301_v51 = vld [vmem:[%s530_s22] ss:$0 sm:$0xff] (!%p1299_p13) }
 0x2d4   : > { %778 = vst [vmem:[#allocation3 + $0x8] sm:$0xff] %v776_v50 }
 0x2d5   : > { %777 = vst [vmem:[#allocation3] sm:$0xff] %v775_v52 }
 0x2db   : > { %v784_v36 = vld [vmem:[#allocation3 + $0x8] sm:$0xff] }
 0x2dc   : > { %v783_v62 = vld [vmem:[#allocation3] sm:$0xff]  ;;  %v788_v40 = vadd.f32 %v786_v37, %v784_v36 }
 0x2dd   : > { %v787_v2 = vadd.f32 %v785_v63, %v783_v62 }
 0x2df   : > { %1449 = vmatprep.mubr.f32.mxu0 %v787_v2 }
 0x2e0   : > { %1450 = vmatmul.mubr.f32.vlgmr.msra.gmra.mrb[0].mxu0 %v788_v40 }
 0x3b3   : > { %v1451_v45 = vpop.f32.mrb[0].mxu0 }
 0x3b4   : > { %v884_v46 = vadd.f32 %v1451_v45, %v1300_v44  ;;  %v878_v47 = vpop.f32.mrb[1].mxu0 }
 0x3b5   : > { %v879_v48 = vadd.f32 %v1300_v44, %v878_v47 }
 0x3b6   : > { %v888_v50 = vmax.f32 %v884_v46, 0.0 }
 0x3b7   : > { %v887_v49 = vmax.f32 %v879_v48, 0.0 }
 0x3b9   : > { %1484 = vmatprep.mubr.f32.mxu1 %v887_v49 }
 0x3ba   : > { %1485 = vmatmul.mubr.f32.vlgmr.msra.gmra.mrb[0].mxu1 %v888_v50 }
 0x48d   : > { %v1486_v52 = vpop.f32.mrb[0].mxu1 }
 0x48e   : > { %v984_v53 = vadd.f32 %v1486_v52, %v1301_v51  ;;  %v978_v54 = vpop.f32.mrb[1].mxu1 }
 0x48f   : > { %v979_v55 = vadd.f32 %v1301_v51, %v978_v54 }
 0x490   : > { %v988_v56 = vmax.f32 %v984_v53, 0.0 }
 0x491   : > { %v987_v57 = vmax.f32 %v979_v55, 0.0 }
 0x492   : > { %990 = vst [vmem:[#allocation2 + $0x8] sm:$0xff] %v988_v56 }
 0x493   : > { %989 = vst [vmem:[#allocation2] sm:$0xff] %v987_v57 }
 0x494 PF: > { %s2748_s10 = sld [smem:[#allocation30_spill]] }
 0x49a   : > { %p991_p4 = scmp.eq.s32.totalorder %s2748_s10, 1 }
 0x49c   : > { %p992_p0 = pnand %p991_p4, %p779_p11 }
 0x49d   : > { %v1004_v58 = vld [vmem:[#allocation2] sm:$0xff] (!%p992_p0)  ;;  %v1005_v59 = vld [vmem:[#allocation2 + $0x8] sm:$0xff] (!%p992_p0)  ;;  %s2750_s22 = sld [smem:[#allocation41_spill]] (!%p992_p0)  ;;  %v2048_v61 = vmov (!%p992_p0), 0.0|0.0   ;;  %vm1079_vm4 = vcmask (!%p992_p0), 123904   ;;  %v2049_v63 = vmov (!%p992_p0), 0.0  }
 0x49e   : > { %995 = sbr.rel (%p992_p0) target bundleno = 1405 (0x57d), region = 99  ;;  %1594 = vmatprep.subr.bf16.mxu0 (!%p992_p0), %v2048_v61  ;;  %v1595_v62 = vpack.c.bf16 (!%p992_p0), %v1005_v59, %v1004_v58  ;;  %vm2050_vm5 = vmmov (!%p992_p0), 0  }
 0x49f   : > { %1491 = vmatprep.mubr.msk.f32.mxu0 (!%p992_p0), %vm2050_vm5, %v2049_v63 }
 0x4a0   : > { %1596 = vmatpush3.bf16.msra.mxu0 (!%p992_p0), %v1595_v62 }
 0x4a3   : > { %v1302_v60 = vld [vmem:[%s2750_s22] ss:$0 sm:$0xff] (!%p992_p0) }
 0x4a4   : > { %vm1001_vm3 = vcmp.eq.s32.totalorder (!%p992_p0), %v1302_v60, %v2533_v39 }
 0x4a5   : > { %v1303_v0 = vsel %vm1001_vm3, 1.0, %v2049_v63 }
 0x4a6   : > { %v1080_v1 = vsel %vm1079_vm4, %v1303_v0, 0.0  ;;  %1492 = vmatmul.mubr.msk.f32.vlgmr.msra.gmra.mrb[0].mxu0 %vm693_vm0, %v1303_v0 }
 0x4a7   : > { %1081 = vadd.xlane.f32.xlu0 %v1080_v1 }
 0x534   : > { %v1082_v2 = vpop.xlane.xlu0 %1081 }
 0x535   : > { %v1083_v3 = vmax.f32 %v1082_v2, 1.0 }
 0x537   : > { %1734 = vrcp.f32 %v1083_v3 }
 0x541   : > { %v1735_v4 = vpop.eup %1734 }
 0x579   : > { %v1075_v5 = vpop.f32.mrb[0].mxu0 }
 0x57a   : > { %v1085_v6 = vmul.f32 %v1735_v4, %v1075_v5  ;;  %v1493_v7 = vpop.f32.mrb[1].mxu0 }
 0x57c   : > { %1086 = vst [vmem:[#allocation16] sm:$0x3] %v1085_v6 }
 0x57d PF: > { %s2751_s0 = sld [smem:[#allocation33_spill]]  ;;  %s2051_s5 = smov [#allocation16]  }
 0x57e   : > { %s1094_s13 = sshll.u32 %s2051_s5, 4  ;;  %s1095_s13 = int_to_ptr.vmem [resolvable:$true] %s1094_s13 }
 0x57f   : > { %s1894_s26 = scalar_lea.vmem %s1095_s13, 32  ;;  %p1901_p1 = scmp.lt.s32.totalorder %s1095_s13, %s1095_s13 }
 0x580   : > { %p1895_p10 = scmp.ne.s32.totalorder %s1095_s13, %s1894_s26  ;;  %p1902_p3 = scmp.lt.s32.totalorder %s1894_s26, %s1894_s26 }
 0x582   : > { %p1903_p5 = por %p1902_p3, %p1901_p1 }
 0x583   : > { %p1626_p12 = scmp.eq.s32.totalorder %s2751_s0, 3 }
 0x585   : > { %p1896_p2 = pnand %p1895_p10, %p1626_p12 }
 0x587   : > { %p1897_p6 = pneg %p1896_p2 }
 0x589   : > { %p1904_p7 = pnand %p1903_p5, %p1897_p6 }
 0x58b   : > { %1907 = shalt.err (!%p1904_p7)
}
 0x58c   : > { %s2752_s15 = sld [smem:[#allocation48_spill]] }
 0x592   : > { %s2753_s18 = smov %s2752_s15  ;;  %s1908_s8 = scalar_lea.hbm %s2752_s15, 32 }
 0x593   : > { %p1909_p8 = scmp.ne.s32.totalorder %s2753_s18, %s1908_s8  ;;  %p1914_p13 = scmp.lt.u32.totalorder %s1908_s8, %s2753_s18 }
 0x595   : > { %p1910_p9 = pnand %p1909_p8, %p1626_p12 }
 0x597   : > { %p1911_p11 = pneg %p1910_p9 }
 0x599   : > { %p1916_p4 = pnand %p1914_p13, %p1911_p11 }
 0x59b   : > { %1919 = shalt.err (!%p1916_p4)
}
 0x59c   : > { %1609 = dma.vmem_to_hbm [thread:$0]  (%p1626_p12), %s1095_s13, 32, %s2753_s18, [#allocation10]  }
 0x59d   : > { %1987 = dma.done.wait (%p1626_p12), [#allocation10], 32  }
 0x59e   : > { %1989 = vsyncadd (%p1626_p12), [#allocation10], 4294967264 }
 0x59f PF: > { %s35_s17 = sadd.s32 1, %s2032_s17   ;;  %s2754_s19 = sld [smem:[#allocation37_spill]] }
 0x5a0   : > { %p32_p0 = scmp.ge.s32.totalorder %s35_s17, 6   ;;  %s2755_s30 = sld [smem:[#allocation27_spill]] }
 0x5a1   : > { %s2756_s12 = sld [smem:[#allocation28_spill]]  ;;  %s2757_s0 = sld [smem:[#allocation36_spill]] }
 0x5a2   : > { %s2758_s13 = sld [smem:[#allocation31_spill]]  ;;  %s2759_s14 = sld [smem:[#allocation32_spill]] }
 0x5a3   : > { %s2760_s15 = sld [smem:[#allocation34_spill]]  ;;  %s2761_s16 = sld [smem:[#allocation35_spill]] }
 0x5a4   : > { %s2762_s27 = smov %s1996_s28  ;;  %s2763_s28 = smov %s2000_s29 }
 0x5a5   : > { %s2764_s29 = smov %s2754_s19  ;;  %34 = sbr.rel (!%p32_p0) target bundleno = 30 (0x1e), region = 182 }
 0x5ac   :  { %1107 = vsyncpa [#allocation9], 1 }
 0x5ad   :  { %1109 = vsyncpa [#allocation9 + $0x1], 1 }
 0x5ae   :  { %1110 = vsyncpa [#allocation12], 1 }
 0x5af   :  { %1112 = vsyncpa [#allocation12 + $0x1], 1 }
 0x5b0   :  { %1113 = vsyncpa [#allocation15], 1 }
 0x5b1   :  { %1115 = vsyncpa [#allocation15 + $0x1], 1 }
 0x5b2   :  { %1116 = vsyncpa [#allocation10], 1 }
 0x5b3   :  { %1118 = vsyncpa [#allocation10 + $0x1], 1 }
 0x5b4   :  { %1119 = vsyncmov [#allocation5] }
 0x5b7   :  { %s1120_s20 = vpop.sfrf %1119 }
 0x5b8   :  { %p1309_p12 = scmp.ne.s32.totalorder %s1120_s20, 0 }
 0x5ba   :  { %1124 = shalt.err (%p1309_p12)  }

</bundles_post_ra>
